<compile_context>
chip_gen: v6e
topology: v6e:2x2x1
jax: 0.10.0
libtpu: 0.0.40
codegen_flags: <defaults>
</compile_context>

<pallas_src>
import jax
import jax.numpy as jnp
from jax.experimental import pallas as pl
from jax.experimental.pallas import tpu as pltpu


def _round_up(x, m):
    return ((x + m - 1) // m) * m


def _make_mlp_kernel(layer_dims):
    """Build a fused kernel for dims [n_in, h0, ..., h_{L-1}, 1]."""
    num_layers = len(layer_dims) - 1
    offsets = []
    off = 0
    for d in layer_dims[1:]:
        offsets.append((off, d))
        off += d

    def kernel(*refs):
        x_ref = refs[0]
        w_refs = refs[1:1 + num_layers]
        b_ref = refs[1 + num_layers]
        out_ref = refs[2 + num_layers]

        h = x_ref[...]                                   # (TILE_B, n_in)
        for li in range(num_layers - 1):                 # hidden Linear + Tanh
            o, d = offsets[li]
            b = b_ref[:, o:o + d]                        # (1, d) row bias
            h = jnp.tanh(
                jnp.dot(h, w_refs[li][...], preferred_element_type=jnp.float32) + b
            )
        # Final Linear: weight is stored transposed as (1, in) so the result is a
        # lane-dense (1, TILE_B) row (avoids 1-wide masked vst.msk stores).
        o, d = offsets[-1]
        b_last = b_ref[:, o:o + d]                       # (1, 1) — out dim is 1
        out_ref[...] = (
            jnp.dot(w_refs[-1][...], h.T, preferred_element_type=jnp.float32) + b_last
        )
        # NOTE: PyTorch forward hooks only stash intermediate activations as a side
        # effect; forward() returns the final Linear output, which is what we compute.

    return kernel


def continiousd_forward(x, params, tile_b=512):
    """Fused MLP forward: tanh(x@W0+b0) -> ... -> .@W_last + b_last."""
    B, n_in = x.shape
    num_layers = len(params)
    layer_dims = [n_in] + [w.shape[1] for (w, _) in params]
    assert layer_dims[-1] == 1, "ContiniousdModel always has a single output unit"

    # Hidden weights kept as [in, out]; final layer transposed to [out(=1), in]
    # so the last matmul directly produces a lane-dense row.
    ws = [w for (w, _) in params[:-1]] + [params[-1][0].T]

    # Pack every bias into one lane-padded row -> single VMEM-resident buffer.
    total_bias = sum(layer_dims[1:])
    packed_w = max(128, _round_up(total_bias, 128))
    bias_packed = jnp.zeros((1, packed_w), jnp.float32)
    off = 0
    for (_, b) in params:
        d = b.size
        bias_packed = bias_packed.at[:, off:off + d].set(b.reshape(1, d))
        off += d

    # Batch tiling: lane-dense output requires TILE_B % 128 == 0; pad B up to a
    # multiple of the tile (padded rows are independent garbage, sliced off below).
    tb = min(tile_b, _round_up(B, 128))
    b_pad = _round_up(B, tb)
    x_p = jnp.pad(x, ((0, b_pad - B), (0, 0))) if b_pad != B else x
    grid = (b_pad // tb,)

    kernel = _make_mlp_kernel(tuple(layer_dims))

    dot_flops = sum(layer_dims[i] * layer_dims[i + 1] for i in range(num_layers))
    cost = pl.CostEstimate(
        flops=2 * b_pad * dot_flops,
        transcendentals=b_pad * sum(layer_dims[1:-1]),
        bytes_accessed=4 * (b_pad * n_in + b_pad + dot_flops + packed_w),
    )

    in_specs = [pl.BlockSpec((tb, n_in), lambda i: (i, 0))]          # streamed x tiles
    for w in ws:
        in_specs.append(pl.BlockSpec(w.shape, lambda i: (0, 0)))     # VMEM-resident
    in_specs.append(pl.BlockSpec((1, packed_w), lambda i: (0, 0)))   # VMEM-resident

    out = pl.pallas_call(
        kernel,
        out_shape=jax.ShapeDtypeStruct((1, b_pad), jnp.float32),
        grid=grid,
        in_specs=in_specs,
        out_specs=pl.BlockSpec((1, tb), lambda i: (0, i)),           # lane-dense store
        compiler_params=pltpu.CompilerParams(
            dimension_semantics=("parallel",),
        ),
        cost_estimate=cost,
    )(x_p, *ws, bias_packed)

    return out[0, :B].reshape(B, 1)


def init_params(key, n_inputs, hidden_layers):
    """Deterministic init matching nn.Linear shapes (torch W: [out, in], b: [out])."""
    dims = [n_inputs] + list(hidden_layers) + [1]
    params = []
    for i in range(len(dims) - 1):
        fan_in, fan_out = dims[i], dims[i + 1]
        key, kw, kb = jax.random.split(key, 3)
        bound = 1.0 / jnp.sqrt(fan_in)
        w_torch = jax.random.uniform(kw, (fan_out, fan_in), jnp.float32, -bound, bound)
        b_torch = jax.random.uniform(kb, (fan_out,), jnp.float32, -bound, bound)
        # kernel layout: W as [in, out], bias as [1, out]
        params.append((w_torch.T, b_torch.reshape(1, fan_out)))
    return params


def reference_forward(x, params):
    h = x
    for (w, b) in params[:-1]:
        h = jnp.tanh(h @ w + b)
    w, b = params[-1]
    return h @ w + b


if __name__ == "__main__":
    batch = 8
    n_inputs = 32
    hidden_layers = [32, 32]

    key = jax.random.PRNGKey(0)
    kx, kp, kx2 = jax.random.split(key, 3)
    x = jax.random.normal(kx, (batch, n_inputs), dtype=jnp.float32)
    params = init_params(kp, n_inputs, hidden_layers)

    # Small-batch path (single tile, padded to 128 rows internally).
    out = jax.block_until_ready(continiousd_forward(x, params))
    ref = reference_forward(x, params)
    assert out.shape == (batch, 1), out.shape
    assert jnp.allclose(out, ref, atol=1e-5, rtol=1e-5), (out, ref)

    # Multi-tile path: exercises batch tiling, resident weights and padded tail.
    x_big = jax.random.normal(kx2, (1000, n_inputs), dtype=jnp.float32)
    out_big = jax.block_until_ready(continiousd_forward(x_big, params, tile_b=512))
    ref_big = reference_forward(x_big, params)
    assert out_big.shape == (1000, 1), out_big.shape
    assert jnp.allclose(out_big, ref_big, atol=1e-5, rtol=1e-5)

    print("KERNEL_OK")
</pallas_src>

<mosaic_0001>
module attributes {stable_mosaic.version = 11 : i64} {
  func.func @kernel(%arg0: i32, %arg1: memref<128x32xf32, #tpu.memory_space<vmem>>, %arg2: memref<32x32xf32, #tpu.memory_space<vmem>>, %arg3: memref<32x32xf32, #tpu.memory_space<vmem>>, %arg4: memref<1x32xf32, #tpu.memory_space<vmem>>, %arg5: memref<1x128xf32, #tpu.memory_space<vmem>>, %arg6: memref<1x128xf32, #tpu.memory_space<vmem>>) attributes {dimension_semantics = [#tpu.dimension_semantics<parallel>], iteration_bounds = array<i64: 1>, scalar_prefetch = 0 : i64, scratch_operands = 0 : i64, tpu.core_type = #tpu.core_type<tc>, window_params = [{transform_indices = @transform_0, window_bounds = array<i64: 128, 32>}, {pipeline_mode = #tpu.pipeline_mode<synchronous>, transform_indices = @transform_1, window_bounds = array<i64: 32, 32>}, {pipeline_mode = #tpu.pipeline_mode<synchronous>, transform_indices = @transform_2, window_bounds = array<i64: 32, 32>}, {pipeline_mode = #tpu.pipeline_mode<synchronous>, transform_indices = @transform_3, window_bounds = array<i64: 1, 32>}, {pipeline_mode = #tpu.pipeline_mode<synchronous>, transform_indices = @transform_4, window_bounds = array<i64: 1, 128>}, {transform_indices = @transform_5, window_bounds = array<i64: 1, 128>}]} {
    %c0 = arith.constant 0 : index
    %c0_0 = arith.constant 0 : index
    %0 = vector.load %arg1[%c0, %c0_0] : memref<128x32xf32, #tpu.memory_space<vmem>>, vector<128x32xf32>
    %c0_1 = arith.constant 0 : index
    %c0_2 = arith.constant 0 : index
    %1 = vector.load %arg5[%c0_1, %c0_2] : memref<1x128xf32, #tpu.memory_space<vmem>>, vector<1x32xf32>
    %c0_3 = arith.constant 0 : index
    %c0_4 = arith.constant 0 : index
    %2 = vector.load %arg2[%c0_3, %c0_4] : memref<32x32xf32, #tpu.memory_space<vmem>>, vector<32x32xf32>
    %cst = arith.constant dense<0.000000e+00> : vector<128x32xf32>
    %3 = tpu.matmul %0, %2, %cst {dimension_numbers = #tpu.dot_dimension_numbers<[1], [0], [0], [1], [0, 0, 1, 1], [], []>} : vector<128x32xf32>, vector<32x32xf32>, vector<128x32xf32> -> vector<128x32xf32>
    %4 = vector.broadcast %1 : vector<1x32xf32> to vector<128x32xf32>
    %5 = arith.addf %3, %4 : vector<128x32xf32>
    %6 = math.tanh %5 : vector<128x32xf32>
    %c0_5 = arith.constant 0 : index
    %c32 = arith.constant 32 : index
    %7 = vector.load %arg5[%c0_5, %c32] : memref<1x128xf32, #tpu.memory_space<vmem>>, vector<1x32xf32>
    %c0_6 = arith.constant 0 : index
    %c0_7 = arith.constant 0 : index
    %8 = vector.load %arg3[%c0_6, %c0_7] : memref<32x32xf32, #tpu.memory_space<vmem>>, vector<32x32xf32>
    %cst_8 = arith.constant dense<0.000000e+00> : vector<128x32xf32>
    %9 = tpu.matmul %6, %8, %cst_8 {dimension_numbers = #tpu.dot_dimension_numbers<[1], [0], [0], [1], [0, 0, 1, 1], [], []>} : vector<128x32xf32>, vector<32x32xf32>, vector<128x32xf32> -> vector<128x32xf32>
    %10 = vector.broadcast %7 : vector<1x32xf32> to vector<128x32xf32>
    %11 = arith.addf %9, %10 : vector<128x32xf32>
    %12 = math.tanh %11 : vector<128x32xf32>
    %c0_9 = arith.constant 0 : index
    %c64 = arith.constant 64 : index
    %13 = vector.load %arg5[%c0_9, %c64] : memref<1x128xf32, #tpu.memory_space<vmem>>, vector<1x1xf32>
    %c0_10 = arith.constant 0 : index
    %c0_11 = arith.constant 0 : index
    %14 = vector.load %arg4[%c0_10, %c0_11] : memref<1x32xf32, #tpu.memory_space<vmem>>, vector<1x32xf32>
    %15 = tpu.transpose %12, [1, 0] : vector<128x32xf32> -> vector<32x128xf32>
    %cst_12 = arith.constant dense<0.000000e+00> : vector<1x128xf32>
    %16 = tpu.matmul %14, %15, %cst_12 {dimension_numbers = #tpu.dot_dimension_numbers<[1], [0], [0], [1], [0, 0, 1, 1], [], []>} : vector<1x32xf32>, vector<32x128xf32>, vector<1x128xf32> -> vector<1x128xf32>
    %17 = vector.broadcast %13 : vector<1x1xf32> to vector<1x128xf32>
    %18 = arith.addf %16, %17 : vector<1x128xf32>
    %c0_13 = arith.constant 0 : index
    %c0_14 = arith.constant 0 : index
    %19 = vector.load %arg6[%c0_13, %c0_14] : memref<1x128xf32, #tpu.memory_space<vmem>>, vector<1x128xf32>
    tpu.vector_store %arg6[%c0_13, %c0_14], %18 {strides = array<i32>} : memref<1x128xf32, #tpu.memory_space<vmem>>, vector<1x128xf32>,
    return
  }
  func.func @transform_0(%arg0: i32) -> (i32, i32) {
    %c0_i32 = arith.constant 0 : i32
    %c0_i32_0 = arith.constant 0 : i32
    return %arg0, %c0_i32 : i32, i32
  }
  func.func @transform_1(%arg0: i32) -> (i32, i32) {
    %c0_i32 = arith.constant 0 : i32
    %c0_i32_0 = arith.constant 0 : i32
    %c0_i32_1 = arith.constant 0 : i32
    return %c0_i32, %c0_i32_0 : i32, i32
  }
  func.func @transform_2(%arg0: i32) -> (i32, i32) {
    %c0_i32 = arith.constant 0 : i32
    %c0_i32_0 = arith.constant 0 : i32
    %c0_i32_1 = arith.constant 0 : i32
    return %c0_i32, %c0_i32_0 : i32, i32
  }
  func.func @transform_3(%arg0: i32) -> (i32, i32) {
    %c0_i32 = arith.constant 0 : i32
    %c0_i32_0 = arith.constant 0 : i32
    %c0_i32_1 = arith.constant 0 : i32
    return %c0_i32, %c0_i32_0 : i32, i32
  }
  func.func @transform_4(%arg0: i32) -> (i32, i32) {
    %c0_i32 = arith.constant 0 : i32
    %c0_i32_0 = arith.constant 0 : i32
    %c0_i32_1 = arith.constant 0 : i32
    return %c0_i32, %c0_i32_0 : i32, i32
  }
  func.func @transform_5(%arg0: i32) -> (i32, i32) {
    %c0_i32 = arith.constant 0 : i32
    %c0_i32_0 = arith.constant 0 : i32
    return %c0_i32, %arg0 : i32, i32
  }
}

</mosaic_0001>

<bundles_post_ra>
// kernel: tpu_custom_call.1
= control target key start
LH: loop header
LB: loop body
LE: loop exit
PB: predicated region body
PF: predicated region fallthrough
CT: control target
= control target key end

     0   :  { %vm48_vm0 = vcmask 261120   ;;  %s1136_s0 = inlined_call_operand.vmem [shape: f32[128,32], index: 0, kind: input, shape index: {}]   ;;  %s1137_s1 = inlined_call_operand.vmem [shape: f32[32,32], index: 1, kind: input, shape index: {}]   ;;  %s1138_s2 = inlined_call_operand.vmem [shape: f32[32,32], index: 2, kind: input, shape index: {}]   ;;  %s1139_s3 = inlined_call_operand.vmem [shape: f32[1,32], index: 3, kind: input, shape index: {}]   ;;  %s1140_s4 = inlined_call_operand.vmem [shape: f32[1,128], index: 4, kind: input, shape index: {}]   ;;  %s1141_s5 = inlined_call_operand.hbm [shape: f32[1,128], index: 5, kind: output, shape index: {}]  }
   0x1   :  { %v41_v0 = vld [vmem:[%s1137_s1 + $0x18] sm:$0xff]  ;;  %v40_v1 = vld [vmem:[%s1137_s1 + $0x10] sm:$0xff]  ;;  %v21_v2 = vld [vmem:[%s1136_s0] sm:$0xff] }
   0x2   :  { %725 = vmatprep.subr.mxu1 %v41_v0  ;;  %v39_v3 = vld [vmem:[%s1137_s1 + $0x8] sm:$0xff]  ;;  %733 = vmatprep.mubr.msk.f32.mxu1 %vm48_vm0, %v21_v2  ;;  %v38_v4 = vld [vmem:[%s1137_s1] sm:$0xff]  ;;  %v261_v6 = vld [vmem:[%s1138_s2 + $0x18] sm:$0xff] }
   0x3   :  { %726 = vmatpush3.msra.mxu1 %v41_v0  ;;  %v22_v5 = vld [vmem:[%s1136_s0 + $0x8] sm:$0xff]  ;;  %v23_v7 = vld [vmem:[%s1136_s0 + $0x10] sm:$0xff] }
   0x4   :  { %727 = vmatprep.subr.mxu1 %v40_v1 }
   0x5   :  { %728 = vmatpush3.msra.mxu1 %v40_v1 }
   0x6   :  { %729 = vmatprep.subr.mxu1 %v39_v3 }
   0x7   :  { %730 = vmatpush3.msra.mxu1 %v39_v3 }
   0x8   :  { %731 = vmatprep.subr.mxu1 %v38_v4 }
   0x9   :  { %10 = vsyncpa [#allocation3], 0  ;;  %732 = vmatpush3.msra.mxu1 %v38_v4  ;;  %v260_v8 = vld [vmem:[%s1138_s2 + $0x10] sm:$0xff]  ;;  %v24_v9 = vld [vmem:[%s1136_s0 + $0x18] sm:$0xff]  ;;  %v43_v24 = vlaneseq  ;;  %s916_s15 = smov 96   ;;  %vm918_vm1 = vmmov 0  }
   0xa   :  { %734 = vmatmul.mubr.msk.f32.vlgmr.msra.gmra.mxu1 %vm48_vm0, %v22_v5  ;;  %757 = vmatprep.subr.mxu1 %v261_v6  ;;  %v25_v10 = vld [vmem:[%s1136_s0 + $0x20] sm:$0xff]  ;;  %v26_v11 = vld [vmem:[%s1136_s0 + $0x28] sm:$0xff]  ;;  %v27_v12 = vld [vmem:[%s1136_s0 + $0x30] sm:$0xff]  ;;  %s920_s16 = smov [#allocation2]  }
   0xb   :  { %736 = vmatprep.mubr.msk.f32.mxu1 %vm48_vm0, %v23_v7  ;;  %758 = vmatpush3.msra.mxu1 %v261_v6  ;;  %v28_v13 = vld [vmem:[%s1136_s0 + $0x38] sm:$0xff]  ;;  %v29_v14 = vld [vmem:[%s1136_s0 + $0x40] sm:$0xff]  ;;  %v30_v15 = vld [vmem:[%s1136_s0 + $0x48] sm:$0xff]  ;;  %v1039_v25 = vshrl.u32 %v43_v24, 7  ;;  %s611_s17 = sshll.u32 %s920_s16, 4  ;;  %s612_s17 = int_to_ptr.vmem [resolvable:$true] %s611_s17 }
   0xc   :  { %759 = vmatprep.subr.mxu1 %v260_v8  ;;  %v31_v16 = vld [vmem:[%s1136_s0 + $0x50] sm:$0xff]  ;;  %v32_v17 = vld [vmem:[%s1136_s0 + $0x58] sm:$0xff]  ;;  %v33_v18 = vld [vmem:[%s1136_s0 + $0x60] sm:$0xff]  ;;  %s894_s18 = scalar_lea.vmem %s612_s17, 16  ;;  %s898_s19 = scalar_lea.vmem %s612_s17, 32 }
   0xd   :  { %760 = vmatpush3.msra.mxu1 %v260_v8  ;;  %v34_v19 = vld [vmem:[%s1136_s0 + $0x68] sm:$0xff]  ;;  %v35_v20 = vld [vmem:[%s1136_s0 + $0x70] sm:$0xff]  ;;  %v36_v21 = vld [vmem:[%s1136_s0 + $0x78] sm:$0xff]  ;;  %v45_v26 = vsub.s32 0, %v1039_v25  ;;  %p895_p0 = scmp.ne.s32.totalorder %s612_s17, %s894_s18  ;;  %p899_p1 = scmp.lt.s32.totalorder %s612_s17, %s612_s17 }
   0xe   :  { %737 = vmatmul.mubr.msk.f32.gmra.mxu1 %vm48_vm0, %v24_v9  ;;  %v259_v22 = vld [vmem:[%s1138_s2 + $0x8] sm:$0xff]  ;;  %v258_v23 = vld [vmem:[%s1138_s2] sm:$0xff]  ;;  %p900_p2 = scmp.lt.s32.totalorder %s898_s19, %s894_s18 }
   0xf   :  { %739 = vmatprep.mubr.msk.f32.mxu1 %vm48_vm0, %v25_v10  ;;  %761 = vmatprep.subr.mxu1 %v259_v22  ;;  %v1045_v27 = vld [vmem:[%s1140_s4] sm:$0x1] }
  0x10   :  { %762 = vmatpush3.msra.mxu1 %v259_v22  ;;  %v46_v28 = vrot.slane %v1045_v27, %v45_v26  ;;  %p901_p3 = por %p900_p2, %p899_p1 }
  0x11   :  { %763 = vmatprep.subr.mxu1 %v258_v23 }
  0x12   :  { %740 = vmatmul.mubr.msk.f32.gmra.mxu1 %vm48_vm0, %v26_v11  ;;  %262 = vrot.lane.b32.xlu0 %v46_v28, %s916_s15  ;;  %p902_p4 = pnand %p901_p3, %p895_p0 }
  0x13   :  { %742 = vmatprep.mubr.msk.f32.mxu1 %vm48_vm0, %v27_v12  ;;  %764 = vmatpush3.msra.mxu1 %v258_v23 }
  0x16   :  { %743 = vmatmul.mubr.msk.f32.gmra.mxu1 %vm48_vm0, %v28_v13  ;;  %v917_v13 = vmov 0.0  }
  0x17   :  { %745 = vmatprep.mubr.msk.f32.mxu1 %vm48_vm0, %v29_v14  ;;  %789 = vmatprep.subr.mxu0 %v917_v13  ;;  %v919_v14 = vmov 64  }
  0x18   :  { %821 = vmatprep.mubr.msk.f32.mxu0 %vm918_vm1, %v917_v13  ;;  %829 = vset.pattern.permute.xlu0 %v919_v14 }
  0x19   :  { %476 = vperm.xlu0 %829, %v1045_v27  }
  0x1a   :  { %746 = vmatmul.mubr.msk.f32.gmra.mxu1 %vm48_vm0, %v30_v15 }
  0x1b   :  { %748 = vmatprep.mubr.msk.f32.mxu1 %vm48_vm0, %v31_v16 }
  0x1e   :  { %749 = vmatmul.mubr.msk.f32.gmra.mxu1 %vm48_vm0, %v32_v17 }
  0x1f   :  { %751 = vmatprep.mubr.msk.f32.mxu1 %vm48_vm0, %v33_v18 }
  0x22   :  { %752 = vmatmul.mubr.msk.f32.gmra.mxu1 %vm48_vm0, %v34_v19 }
  0x23   :  { %754 = vmatprep.mubr.msk.f32.mxu1 %vm48_vm0, %v35_v20 }
  0x26   :  { %755 = vmatmul.mubr.msk.f32.gmra.mxu1 %vm48_vm0, %v36_v21 }
  0xca   :  { %v735_v29 = vpop.f32.mrf.mxu1 }
  0xcb   :  { %v169_v30 = vadd.f32 %v735_v29, %v46_v28 }
  0xcc   :  { %v163_v31 = vpop.f32.mrf.mxu1 }
  0xcd   :  { %v164_v32 = vadd.f32 %v163_v31, %v46_v28 }
  0xce   :  { %v738_v33 = vpop.f32.mrf.mxu1 }
  0xcf   :  { %830 = vtanh.f32 %v164_v32  ;;  %v179_v34 = vadd.f32 %v738_v33, %v46_v28  ;;  %v1075_v32 = vpop.permute.xlu0 %262 }
  0xd0   :  { %832 = vtanh.f32 %v169_v30  ;;  %v173_v35 = vpop.f32.mrf.mxu1 }
  0xd1   :  { %v174_v36 = vadd.f32 %v173_v35, %v46_v28 }
  0xd2   :  { %v741_v37 = vpop.f32.mrf.mxu1 }
  0xd3   :  { %834 = vtanh.f32 %v174_v36  ;;  %v189_v38 = vadd.f32 %v741_v37, %v46_v28 }
  0xd4   :  { %836 = vtanh.f32 %v179_v34  ;;  %v183_v39 = vpop.f32.mrf.mxu1 }
  0xd5   :  { %v184_v40 = vadd.f32 %v183_v39, %v46_v28 }
  0xd6   :  { %v744_v41 = vpop.f32.mrf.mxu1 }
  0xd7   :  { %838 = vtanh.f32 %v184_v40  ;;  %v199_v42 = vadd.f32 %v744_v41, %v46_v28 }
  0xd8   :  { %840 = vtanh.f32 %v189_v38  ;;  %v193_v43 = vpop.f32.mrf.mxu1 }
  0xd9   :  { %v194_v44 = vadd.f32 %v193_v43, %v46_v28 }
  0xda   :  { %v747_v45 = vpop.f32.mrf.mxu1 }
  0xdb   :  { %842 = vtanh.f32 %v194_v44  ;;  %v209_v47 = vadd.f32 %v747_v45, %v46_v28 }
  0xdc   :  { %v831_v46 = vpop.eup %830  ;;  %844 = vtanh.f32 %v199_v42  ;;  %v203_v48 = vpop.f32.mrf.mxu1 }
  0xdd   :  { %v833_v49 = vpop.eup %832  ;;  %v204_v50 = vadd.f32 %v203_v48, %v46_v28  ;;  %765 = vmatprep.mubr.msk.f32.mxu1 %vm48_vm0, %v831_v46 }
  0xde   :  { %v750_v51 = vpop.f32.mrf.mxu1  ;;  %766 = vmatmul.mubr.msk.f32.vlgmr.msra.gmra.mxu1 %vm48_vm0, %v833_v49 }
  0xdf   :  { %846 = vtanh.f32 %v204_v50  ;;  %v219_v53 = vadd.f32 %v750_v51, %v46_v28 }
  0xe0   :  { %v835_v52 = vpop.eup %834  ;;  %848 = vtanh.f32 %v209_v47  ;;  %v213_v54 = vpop.f32.mrf.mxu1 }
  0xe1   :  { %v837_v55 = vpop.eup %836  ;;  %v214_v56 = vadd.f32 %v213_v54, %v46_v28  ;;  %768 = vmatprep.mubr.msk.f32.mxu1 %vm48_vm0, %v835_v52 }
  0xe2   :  { %v753_v57 = vpop.f32.mrf.mxu1  ;;  %769 = vmatmul.mubr.msk.f32.gmra.mxu1 %vm48_vm0, %v837_v55 }
  0xe3   :  { %850 = vtanh.f32 %v214_v56  ;;  %v229_v59 = vadd.f32 %v753_v57, %v46_v28 }
  0xe4   :  { %v839_v58 = vpop.eup %838  ;;  %852 = vtanh.f32 %v219_v53  ;;  %v223_v60 = vpop.f32.mrf.mxu1 }
  0xe5   :  { %v841_v61 = vpop.eup %840  ;;  %v224_v62 = vadd.f32 %v223_v60, %v46_v28  ;;  %771 = vmatprep.mubr.msk.f32.mxu1 %vm48_vm0, %v839_v58 }
  0xe6   :  { %v756_v63 = vpop.f32.mrf.mxu1  ;;  %772 = vmatmul.mubr.msk.f32.gmra.mxu1 %vm48_vm0, %v841_v61 }
  0xe7   :  { %854 = vtanh.f32 %v224_v62  ;;  %v239_v1 = vadd.f32 %v756_v63, %v46_v28 }
  0xe8   :  { %v843_v0 = vpop.eup %842  ;;  %856 = vtanh.f32 %v229_v59  ;;  %v233_v2 = vpop.f32.mrf.mxu1 }
  0xe9   :  { %v845_v3 = vpop.eup %844  ;;  %v234_v4 = vadd.f32 %v233_v2, %v46_v28  ;;  %774 = vmatprep.mubr.msk.f32.mxu1 %vm48_vm0, %v843_v0  ;;  %v474_v2 = vld [vmem:[%s1139_s3] sm:$0x1] }
  0xea   :  { %775 = vmatmul.mubr.msk.f32.gmra.mxu1 %vm48_vm0, %v845_v3  ;;  %v477_v3 = vpop.permute.xlu0 %476 }
  0xeb   :  { %858 = vtanh.f32 %v234_v4  ;;  %v482_v4 = vrot.slane %v477_v3, %v45_v26 }
  0xec   :  { %v847_v5 = vpop.eup %846  ;;  %860 = vtanh.f32 %v239_v1 }
  0xed   :  { %v849_v6 = vpop.eup %848  ;;  %777 = vmatprep.mubr.msk.f32.mxu1 %vm48_vm0, %v847_v5 }
  0xee   :  { %778 = vmatmul.mubr.msk.f32.gmra.mxu1 %vm48_vm0, %v849_v6 }
  0xf0   :  { %v851_v7 = vpop.eup %850 }
  0xf1   :  { %v853_v8 = vpop.eup %852  ;;  %780 = vmatprep.mubr.msk.f32.mxu1 %vm48_vm0, %v851_v7 }
  0xf2   :  { %781 = vmatmul.mubr.msk.f32.gmra.mxu1 %vm48_vm0, %v853_v8 }
  0xf4   :  { %v855_v9 = vpop.eup %854 }
  0xf5   :  { %v857_v10 = vpop.eup %856  ;;  %783 = vmatprep.mubr.msk.f32.mxu1 %vm48_vm0, %v855_v9 }
  0xf6   :  { %784 = vmatmul.mubr.msk.f32.gmra.mxu1 %vm48_vm0, %v857_v10 }
  0xf8   :  { %v859_v11 = vpop.eup %858 }
  0xf9   :  { %v861_v12 = vpop.eup %860  ;;  %786 = vmatprep.mubr.msk.f32.mxu1 %vm48_vm0, %v859_v11 }
  0xfa   :  { %787 = vmatmul.mubr.msk.f32.gmra.mxu1 %vm48_vm0, %v861_v12 }
 0x19e   :  { %v1069_v15 = vpop.f32.mrf.mxu1 }
 0x19f   :  { %v385_v58 = vadd.f32 %v1069_v15, %v1075_v32 }
 0x1a0   :  { %v1071_v16 = vpop.f32.mrf.mxu1 }
 0x1a1   :  { %v380_v60 = vadd.f32 %v1071_v16, %v1075_v32 }
 0x1a2   :  { %v770_v17 = vpop.f32.mrf.mxu1 }
 0x1a3   :  { %v395_v54 = vadd.f32 %v770_v17, %v1075_v32 }
 0x1a4   :  { %v1073_v18 = vpop.f32.mrf.mxu1 }
 0x1a5   :  { %v390_v56 = vadd.f32 %v1073_v18, %v1075_v32 }
 0x1a6   :  { %v773_v19 = vpop.f32.mrf.mxu1 }
 0x1a7   :  { %v405_v50 = vadd.f32 %v773_v19, %v1075_v32 }
 0x1a8   :  { %v399_v20 = vpop.f32.mrf.mxu1 }
 0x1a9   :  { %v400_v52 = vadd.f32 %v399_v20, %v1075_v32 }
 0x1aa   :  { %v776_v21 = vpop.f32.mrf.mxu1 }
 0x1ab   :  { %v415_v46 = vadd.f32 %v776_v21, %v1075_v32 }
 0x1ac   :  { %v409_v22 = vpop.f32.mrf.mxu1 }
 0x1ad   :  { %v410_v48 = vadd.f32 %v409_v22, %v1075_v32 }
 0x1ae   :  { %v779_v23 = vpop.f32.mrf.mxu1 }
 0x1af   :  { %v425_v42 = vadd.f32 %v779_v23, %v1075_v32 }
 0x1b0   :  { %v419_v24 = vpop.f32.mrf.mxu1 }
 0x1b1   :  { %v420_v44 = vadd.f32 %v419_v24, %v1075_v32 }
 0x1b2   :  { %v782_v28 = vpop.f32.mrf.mxu1 }
 0x1b3   :  { %v435_v38 = vadd.f32 %v782_v28, %v1075_v32 }
 0x1b4   :  { %v429_v29 = vpop.f32.mrf.mxu1 }
 0x1b5   :  { %v430_v40 = vadd.f32 %v429_v29, %v1075_v32 }
 0x1b6   :  { %v785_v30 = vpop.f32.mrf.mxu1 }
 0x1b7   :  { %v445_v36 = vadd.f32 %v785_v30, %v1075_v32 }
 0x1b8   :  { %v439_v31 = vpop.f32.mrf.mxu1 }
 0x1b9   :  { %v440_v37 = vadd.f32 %v439_v31, %v1075_v32 }
 0x1ba   :  { %v788_v27 = vpop.f32.mrf.mxu1 }
 0x1bb   :  { %v455_v33 = vadd.f32 %v788_v27, %v1075_v32 }
 0x1bc   :  { %v449_v34 = vpop.f32.mrf.mxu1 }
 0x1bd   :  { %862 = vtanh.f32 %v455_v33  ;;  %v450_v35 = vadd.f32 %v449_v34, %v1075_v32 }
 0x1bf   :  { %864 = vtanh.f32 %v450_v35 }
 0x1c0   :  { %866 = vtanh.f32 %v445_v36 }
 0x1c1   :  { %868 = vtanh.f32 %v440_v37 }
 0x1c2   :  { %870 = vtanh.f32 %v435_v38 }
 0x1c3   :  { %872 = vtanh.f32 %v430_v40 }
 0x1c4   :  { %874 = vtanh.f32 %v425_v42 }
 0x1c5   :  { %876 = vtanh.f32 %v420_v44 }
 0x1c6   :  { %878 = vtanh.f32 %v415_v46 }
 0x1c7   :  { %880 = vtanh.f32 %v410_v48 }
 0x1c8   :  { %882 = vtanh.f32 %v405_v50 }
 0x1c9   :  { %884 = vtanh.f32 %v400_v52 }
 0x1ca   :  { %v863_v39 = vpop.eup %862  ;;  %886 = vtanh.f32 %v395_v54 }
 0x1cb   :  { %790 = vmatpush3.xpose.msk.msra.mxu0 %vm48_vm0, %v863_v39  ;;  %888 = vtanh.f32 %v390_v56 }
 0x1cc   :  { %791 = vmatprep.subr.mxu0 %v917_v13  ;;  %v865_v41 = vpop.eup %864  ;;  %890 = vtanh.f32 %v385_v58 }
 0x1cd   :  { %v867_v43 = vpop.eup %866  ;;  %892 = vtanh.f32 %v380_v60 }
 0x1ce   :  { %v869_v45 = vpop.eup %868 }
 0x1cf   :  { %792 = vmatpush3.xpose.msk.msra.mxu0 %vm48_vm0, %v865_v41  ;;  %v871_v47 = vpop.eup %870 }
 0x1d0   :  { %793 = vmatprep.subr.mxu0 %v917_v13  ;;  %v873_v49 = vpop.eup %872 }
 0x1d1   :  { %v875_v51 = vpop.eup %874 }
 0x1d2   :  { %v877_v53 = vpop.eup %876 }
 0x1d3   :  { %794 = vmatpush3.xpose.msk.msra.mxu0 %vm48_vm0, %v867_v43  ;;  %v879_v55 = vpop.eup %878 }
 0x1d4   :  { %795 = vmatprep.subr.mxu0 %v917_v13  ;;  %v881_v57 = vpop.eup %880 }
 0x1d5   :  { %v883_v59 = vpop.eup %882 }
 0x1d6   :  { %v885_v61 = vpop.eup %884 }
 0x1d7   :  { %796 = vmatpush3.xpose.msk.msra.mxu0 %vm48_vm0, %v869_v45  ;;  %v887_v62 = vpop.eup %886 }
 0x1d8   :  { %797 = vmatprep.subr.mxu0 %v917_v13  ;;  %v889_v63 = vpop.eup %888 }
 0x1d9   :  { %v891_v0 = vpop.eup %890 }
 0x1da   :  { %v893_v1 = vpop.eup %892 }
 0x1db   :  { %798 = vmatpush3.xpose.msk.msra.mxu0 %vm48_vm0, %v871_v47 }
 0x1dc   :  { %799 = vmatprep.subr.mxu0 %v917_v13 }
 0x1df   :  { %800 = vmatpush3.xpose.msk.msra.mxu0 %vm48_vm0, %v873_v49 }
 0x1e0   :  { %801 = vmatprep.subr.mxu0 %v917_v13 }
 0x1e3   :  { %802 = vmatpush3.xpose.msk.msra.mxu0 %vm48_vm0, %v875_v51 }
 0x1e4   :  { %803 = vmatprep.subr.mxu0 %v917_v13 }
 0x1e7   :  { %804 = vmatpush3.xpose.msk.msra.mxu0 %vm48_vm0, %v877_v53 }
 0x1e8   :  { %805 = vmatprep.subr.mxu0 %v917_v13 }
 0x1eb   :  { %806 = vmatpush3.xpose.msk.msra.mxu0 %vm48_vm0, %v879_v55 }
 0x1ec   :  { %807 = vmatprep.subr.mxu0 %v917_v13 }
 0x1ef   :  { %808 = vmatpush3.xpose.msk.msra.mxu0 %vm48_vm0, %v881_v57 }
 0x1f0   :  { %809 = vmatprep.subr.mxu0 %v917_v13 }
 0x1f3   :  { %810 = vmatpush3.xpose.msk.msra.mxu0 %vm48_vm0, %v883_v59 }
 0x1f4   :  { %811 = vmatprep.subr.mxu0 %v917_v13 }
 0x1f7   :  { %812 = vmatpush3.xpose.msk.msra.mxu0 %vm48_vm0, %v885_v61 }
 0x1f8   :  { %813 = vmatprep.subr.mxu0 %v917_v13 }
 0x1fb   :  { %814 = vmatpush3.xpose.msk.msra.mxu0 %vm48_vm0, %v887_v62 }
 0x1fc   :  { %815 = vmatprep.subr.mxu0 %v917_v13 }
 0x1ff   :  { %816 = vmatpush3.xpose.msk.msra.mxu0 %vm48_vm0, %v889_v63 }
 0x200   :  { %817 = vmatprep.subr.mxu0 %v917_v13 }
 0x203   :  { %818 = vmatpush3.xpose.msk.msra.mxu0 %vm48_vm0, %v891_v0 }
 0x204   :  { %819 = vmatprep.subr.mxu0 %v917_v13 }
 0x207   :  { %820 = vmatpush3.xpose.msk.msra.mxu0 %vm48_vm0, %v893_v1 }
 0x20a   :  { %822 = vmatmul.mubr.msk.f32.vlgmr.msra.gmra.mxu0 %vm48_vm0, %v474_v2 }
 0x2ca   :  { %v600_v5 = vpop.f32.mrf.mxu0 }
 0x2cb   :  { %v601_v6 = vadd.f32 %v600_v5, %v482_v4 }
 0x2cc   :  { %v823_v7 = vpop.f32.mrf.mxu0 }
 0x2cd   :  { %604 = vst [vmem:[#allocation2] sm:$0x1] %v601_v6 }
 0x2ce   :  { %905 = shalt.err (!%p902_p4)
}
 0x2cf   :  { %614 = dma.vmem_to_hbm [thread:$0]  %s612_s17, 16, %s1141_s5, [#allocation3]  }
 0x2d0   :  { %914 = dma.done.wait [#allocation3], 16  }
 0x2d1   :  { %915 = vsyncadd [#allocation3], 4294967280 }
 0x2d2   :  { %618 = vsyncpa [#allocation3], 1 }

</bundles_post_ra>
